<compile_context>
chip_gen: v6e
topology: v6e:2x2x1
jax: 0.10.0
libtpu: 0.0.40
codegen_flags: <defaults>
</compile_context>

<pallas_src>
import functools

import jax
import jax.numpy as jnp
from jax.experimental import pallas as pl
from jax.experimental.pallas import tpu as pltpu

OBS_DIM = 4      # gym InvertedPendulum-v4 observation space
ACT_DIM = 1      # gym InvertedPendulum-v4 action space
H1 = 16
H2 = 32
N_OUT = 2 * ACT_DIM   # fused [means | stddevs] rows


def _round_up(n, m):
    return ((n + m - 1) // m) * m


def policy_kernel(x_ref, w1_ref, b1_ref, w2_ref, b2_ref, wh_ref, bh_ref,
                  out_ref, *, act_dtype=jnp.float32):
    """All tensors are transposed / lane-dense: batch on the last (lane) axis.

    x_ref  : [OBS_DIM, tb]
    w1_ref : [H1, OBS_DIM], b1_ref: [H1, 1]
    w2_ref : [H2, H1],      b2_ref: [H2, 1]
    wh_ref : [N_OUT, H2],   bh_ref: [N_OUT, 1]   (fused mean|std head)
    out_ref: [N_OUT, tb]    (rows [0,ACT_DIM) = means, rest = stddevs)
    """
    x = x_ref[...]                                                # [4, tb]
    z1 = (jnp.dot(w1_ref[...], x, preferred_element_type=jnp.float32)
          + b1_ref[...])                                          # [16, tb]
    h1 = jnp.tanh(z1.astype(act_dtype))
    z2 = (jnp.dot(w2_ref[...].astype(act_dtype), h1,
                  preferred_element_type=jnp.float32) + b2_ref[...])  # [32,tb]
    h2 = jnp.tanh(z2.astype(act_dtype))
    s = (jnp.dot(wh_ref[...].astype(act_dtype), h2,
                 preferred_element_type=jnp.float32) + bh_ref[...])   # [2, tb]

    # Stable softplus, computed only on the stddev rows (EUP is the binding
    # unit); mean rows stay linear.  Reassemble with a cheap VPU select.
    std_in = s[ACT_DIM:, :]                                       # [1, tb]
    std_sp = jnp.maximum(std_in, 0.0) + jnp.log1p(jnp.exp(-jnp.abs(std_in)))
    row = jax.lax.broadcasted_iota(jnp.int32, s.shape, 0)
    out_ref[...] = jnp.where(row >= ACT_DIM,
                             jnp.broadcast_to(std_sp, s.shape), s)


def pack_params(params):
    """One-time repack: fuse the two heads and transpose for [feat, batch].

    Hoisted out of the per-call forward so no concat/transpose ops are
    dispatched on every policy step.
    """
    w1, b1, w2, b2, wm, bm, ws, bs = params
    w_head = jnp.concatenate([wm, ws], axis=1)     # [H2, N_OUT]
    b_head = jnp.concatenate([bm, bs], axis=1)     # [1,  N_OUT]
    return (w1.T, b1.T, w2.T, b2.T, w_head.T, b_head.T)


def _forward_t(xt, packed, tile_b, use_bf16_activations):
    """xt: [OBS_DIM, B] feature-major -> [N_OUT, B] slab."""
    B = xt.shape[1]
    w1t, b1t, w2t, b2t, wht, bht = packed

    # Big tiles amortize per-grid-step overhead (kernel is EUP-bound), capped
    # so there are >= 2 grid steps when B allows it (v7x has 2 TensorCores).
    tb = max(128, min(tile_b, _round_up(-(-B // 2), 128)))
    grid = pl.cdiv(B, tb)

    kernel = functools.partial(
        policy_kernel,
        act_dtype=jnp.bfloat16 if use_bf16_activations else jnp.float32)

    cost = pl.CostEstimate(
        flops=2 * B * (OBS_DIM * H1 + H1 * H2 + H2 * N_OUT),
        transcendentals=B * (H1 + H2 + 2 * ACT_DIM),
        bytes_accessed=4 * (B * (OBS_DIM + N_OUT)
                            + OBS_DIM * H1 + H1 + H1 * H2 + H2
                            + H2 * N_OUT + N_OUT))

    const = lambda i: (0, 0)                       # weights: VMEM-resident
    out = pl.pallas_call(
        kernel,
        out_shape=jax.ShapeDtypeStruct((N_OUT, B), jnp.float32),
        grid=(grid,),
        in_specs=[
            pl.BlockSpec((OBS_DIM, tb), lambda i: (0, i)),  # x tiles stream
            pl.BlockSpec(w1t.shape, const),
            pl.BlockSpec(b1t.shape, const),
            pl.BlockSpec(w2t.shape, const),
            pl.BlockSpec(b2t.shape, const),
            pl.BlockSpec(wht.shape, const),
            pl.BlockSpec(bht.shape, const),
        ],
        out_specs=pl.BlockSpec((N_OUT, tb), lambda i: (0, i)),
        compiler_params=pltpu.CompilerParams(
            dimension_semantics=("parallel",)),
        cost_estimate=cost,
    )(xt, w1t, b1t, w2t, b2t, wht, bht)
    return out


@functools.partial(jax.jit, static_argnames=("tile_b", "use_bf16_activations"))
def policy_network_forward_t(xt, packed, tile_b=8192,
                             use_bf16_activations=False):
    """Feature-major entry point: xt [OBS_DIM, B] -> [N_OUT, B] slab.

    Row 0..ACT_DIM-1 = means, remaining rows = stddevs.  Use this if the
    rollout buffer stores observations feature-major (no x transpose at all).
    """
    return _forward_t(xt, packed, tile_b, use_bf16_activations)


@functools.partial(jax.jit, static_argnames=("tile_b", "use_bf16_activations"))
def policy_network_forward(x, packed, tile_b=8192,
                           use_bf16_activations=False):
    """x: [B, OBS_DIM] f32 -> (means [B, ACT_DIM], stddevs [B, ACT_DIM])."""
    B = x.shape[0]
    out = _forward_t(x.T, packed, tile_b, use_bf16_activations)
    if ACT_DIM == 1:
        # [1, B] row -> [B, 1] is a pure reshape (no transpose copy).
        means = out[:ACT_DIM].reshape(B, ACT_DIM)
        stddevs = out[ACT_DIM:].reshape(B, ACT_DIM)
    else:
        means = out[:ACT_DIM].T
        stddevs = out[ACT_DIM:].T
    return means, stddevs


def init_params(key):
    """torch.nn.Linear-style init: U[-1/sqrt(fan_in), +1/sqrt(fan_in)]."""
    def linear(key, fan_in, fan_out):
        kw, kb = jax.random.split(key)
        bound = 1.0 / jnp.sqrt(fan_in)
        w = jax.random.uniform(kw, (fan_in, fan_out), jnp.float32, -bound, bound)
        b = jax.random.uniform(kb, (1, fan_out), jnp.float32, -bound, bound)
        return w, b

    k1, k2, k3, k4 = jax.random.split(key, 4)
    w1, b1 = linear(k1, OBS_DIM, H1)
    w2, b2 = linear(k2, H1, H2)
    wm, bm = linear(k3, H2, ACT_DIM)
    ws, bs = linear(k4, H2, ACT_DIM)
    return (w1, b1, w2, b2, wm, bm, ws, bs)


def reference_forward(x, params):
    """Pure-JAX reference (stable softplus) for correctness check."""
    w1, b1, w2, b2, wm, bm, ws, bs = params
    h1 = jnp.tanh(x @ w1 + b1)
    h2 = jnp.tanh(h1 @ w2 + b2)
    means = h2 @ wm + bm
    stddevs = jax.nn.softplus(h2 @ ws + bs)
    return means, stddevs


def _check(B, params, packed, key, tile_b):
    x = jax.random.normal(key, (B, OBS_DIM), jnp.float32)
    means, stddevs = policy_network_forward(x, packed, tile_b=tile_b)
    jax.block_until_ready((means, stddevs))
    ref_means, ref_stddevs = reference_forward(x, params)
    assert means.shape == (B, ACT_DIM) and stddevs.shape == (B, ACT_DIM)
    assert jnp.allclose(means, ref_means, atol=1e-5, rtol=1e-5)
    assert jnp.allclose(stddevs, ref_stddevs, atol=1e-5, rtol=1e-5)
    assert bool(jnp.all(stddevs > 0.0))

    # Feature-major (no-transpose) path must match too.
    slab = policy_network_forward_t(x.T, packed, tile_b=tile_b)
    jax.block_until_ready(slab)
    assert slab.shape == (N_OUT, B)
    assert jnp.allclose(slab[0], ref_means[:, 0], atol=1e-5, rtol=1e-5)
    assert jnp.allclose(slab[ACT_DIM], ref_stddevs[:, 0], atol=1e-5, rtol=1e-5)
    return x, ref_means, ref_stddevs


if __name__ == "__main__":
    key = jax.random.PRNGKey(0)
    kparam, kx1, kx2 = jax.random.split(key, 3)
    params = init_params(kparam)
    packed = pack_params(params)           # one-time repack, hoisted out of forward
    jax.block_until_ready(packed)

    # Small batch (single, partially-masked tile).
    _check(B=8, params=params, packed=packed, key=kx1, tile_b=8192)
    # Batch that exercises the multi-grid-step path + partial last block.
    x300, rm, rs = _check(B=300, params=params, packed=packed, key=kx2, tile_b=256)

    # Optional bf16-activation path (EUP speedup on v6e/v7x; keep f32 on v5e).
    m_bf, s_bf = policy_network_forward(x300, packed, tile_b=256,
                                        use_bf16_activations=True)
    jax.block_until_ready((m_bf, s_bf))
    assert bool(jnp.all(jnp.isfinite(m_bf))) and bool(jnp.all(s_bf > 0.0))
    assert jnp.allclose(m_bf, rm, atol=1e-1, rtol=1e-1)
    assert jnp.allclose(s_bf, rs, atol=1e-1, rtol=1e-1)

    print("KERNEL_OK")
</pallas_src>

<mosaic_0001>
module attributes {stable_mosaic.version = 11 : i64} {
  func.func @policy_kernel(%arg0: i32, %arg1: memref<4x128xf32, #tpu.memory_space<vmem>>, %arg2: memref<16x4xf32, #tpu.memory_space<vmem>>, %arg3: memref<16x1xf32, #tpu.memory_space<vmem>>, %arg4: memref<32x16xf32, #tpu.memory_space<vmem>>, %arg5: memref<32x1xf32, #tpu.memory_space<vmem>>, %arg6: memref<2x32xf32, #tpu.memory_space<vmem>>, %arg7: memref<2x1xf32, #tpu.memory_space<vmem>>, %arg8: memref<2x128xf32, #tpu.memory_space<vmem>>) attributes {dimension_semantics = [#tpu.dimension_semantics<parallel>], iteration_bounds = array<i64: 1>, scalar_prefetch = 0 : i64, scratch_operands = 0 : i64, tpu.core_type = #tpu.core_type<tc>, window_params = [{transform_indices = @transform_0, window_bounds = array<i64: 4, 128>}, {pipeline_mode = #tpu.pipeline_mode<synchronous>, transform_indices = @transform_1, window_bounds = array<i64: 16, 4>}, {pipeline_mode = #tpu.pipeline_mode<synchronous>, transform_indices = @transform_2, window_bounds = array<i64: 16, 1>}, {pipeline_mode = #tpu.pipeline_mode<synchronous>, transform_indices = @transform_3, window_bounds = array<i64: 32, 16>}, {pipeline_mode = #tpu.pipeline_mode<synchronous>, transform_indices = @transform_4, window_bounds = array<i64: 32, 1>}, {pipeline_mode = #tpu.pipeline_mode<synchronous>, transform_indices = @transform_5, window_bounds = array<i64: 2, 32>}, {pipeline_mode = #tpu.pipeline_mode<synchronous>, transform_indices = @transform_6, window_bounds = array<i64: 2, 1>}, {transform_indices = @transform_7, window_bounds = array<i64: 2, 128>}]} {
    %c0 = arith.constant 0 : index
    %c0_0 = arith.constant 0 : index
    %0 = vector.load %arg1[%c0, %c0_0] : memref<4x128xf32, #tpu.memory_space<vmem>>, vector<4x128xf32>
    %c0_1 = arith.constant 0 : index
    %c0_2 = arith.constant 0 : index
    %1 = vector.load %arg2[%c0_1, %c0_2] : memref<16x4xf32, #tpu.memory_space<vmem>>, vector<16x4xf32>
    %cst = arith.constant dense<0.000000e+00> : vector<16x128xf32>
    %2 = tpu.matmul %1, %0, %cst {dimension_numbers = #tpu.dot_dimension_numbers<[1], [0], [0], [1], [0, 0, 1, 1], [], []>} : vector<16x4xf32>, vector<4x128xf32>, vector<16x128xf32> -> vector<16x128xf32>
    %c0_3 = arith.constant 0 : index
    %c0_4 = arith.constant 0 : index
    %3 = vector.load %arg3[%c0_3, %c0_4] : memref<16x1xf32, #tpu.memory_space<vmem>>, vector<16x1xf32>
    %4 = vector.broadcast %3 : vector<16x1xf32> to vector<16x128xf32>
    %5 = arith.addf %2, %4 : vector<16x128xf32>
    %6 = math.tanh %5 : vector<16x128xf32>
    %c0_5 = arith.constant 0 : index
    %c0_6 = arith.constant 0 : index
    %7 = vector.load %arg4[%c0_5, %c0_6] : memref<32x16xf32, #tpu.memory_space<vmem>>, vector<32x16xf32>
    %cst_7 = arith.constant dense<0.000000e+00> : vector<32x128xf32>
    %8 = tpu.matmul %7, %6, %cst_7 {dimension_numbers = #tpu.dot_dimension_numbers<[1], [0], [0], [1], [0, 0, 1, 1], [], []>} : vector<32x16xf32>, vector<16x128xf32>, vector<32x128xf32> -> vector<32x128xf32>
    %c0_8 = arith.constant 0 : index
    %c0_9 = arith.constant 0 : index
    %9 = vector.load %arg5[%c0_8, %c0_9] : memref<32x1xf32, #tpu.memory_space<vmem>>, vector<32x1xf32>
    %10 = vector.broadcast %9 : vector<32x1xf32> to vector<32x128xf32>
    %11 = arith.addf %8, %10 : vector<32x128xf32>
    %12 = math.tanh %11 : vector<32x128xf32>
    %c0_10 = arith.constant 0 : index
    %c0_11 = arith.constant 0 : index
    %13 = vector.load %arg6[%c0_10, %c0_11] : memref<2x32xf32, #tpu.memory_space<vmem>>, vector<2x32xf32>
    %cst_12 = arith.constant dense<0.000000e+00> : vector<2x128xf32>
    %14 = tpu.matmul %13, %12, %cst_12 {dimension_numbers = #tpu.dot_dimension_numbers<[1], [0], [0], [1], [0, 0, 1, 1], [], []>} : vector<2x32xf32>, vector<32x128xf32>, vector<2x128xf32> -> vector<2x128xf32>
    %c0_13 = arith.constant 0 : index
    %c0_14 = arith.constant 0 : index
    %15 = vector.load %arg7[%c0_13, %c0_14] : memref<2x1xf32, #tpu.memory_space<vmem>>, vector<2x1xf32>
    %16 = vector.broadcast %15 : vector<2x1xf32> to vector<2x128xf32>
    %17 = arith.addf %14, %16 : vector<2x128xf32>
    %18 = vector.extract_strided_slice %17 {offsets = [1, 0], sizes = [1, 128], strides = [1, 1]} : vector<2x128xf32> to vector<1x128xf32>
    %cst_15 = arith.constant 0.000000e+00 : f32
    %19 = vector.broadcast %cst_15 : f32 to vector<1x128xf32>
    %20 = arith.maximumf %18, %19 : vector<1x128xf32>
    %21 = math.absf %18 : vector<1x128xf32>
    %cst_16 = arith.constant 0.000000e+00 : f32
    %22 = vector.broadcast %cst_16 : f32 to vector<1x128xf32>
    %23 = arith.subf %22, %21 : vector<1x128xf32>
    %24 = math.exp %23 : vector<1x128xf32>
    %25 = math.log1p %24 : vector<1x128xf32>
    %26 = arith.addf %20, %25 : vector<1x128xf32>
    %27 = tpu.iota {dimensions = array<i32: 0>} : vector<2x128xi32>
    %c1_i32 = arith.constant 1 : i32
    %28 = vector.broadcast %c1_i32 : i32 to vector<2x128xi32>
    %29 = arith.cmpi sge, %27, %28 : vector<2x128xi32>
    %30 = vector.shape_cast %26 : vector<1x128xf32> to vector<1x128xf32>
    %31 = vector.broadcast %30 : vector<1x128xf32> to vector<2x128xf32>
    %32 = arith.select %29, %31, %17 : vector<2x128xi1>, vector<2x128xf32>
    %c0_17 = arith.constant 0 : index
    %c0_18 = arith.constant 0 : index
    %33 = vector.load %arg8[%c0_17, %c0_18] : memref<2x128xf32, #tpu.memory_space<vmem>>, vector<2x128xf32>
    tpu.vector_store %arg8[%c0_17, %c0_18], %32 {strides = array<i32>} : memref<2x128xf32, #tpu.memory_space<vmem>>, vector<2x128xf32>,
    return
  }
  func.func @transform_0(%arg0: i32) -> (i32, i32) {
    %c0_i32 = arith.constant 0 : i32
    %c0_i32_0 = arith.constant 0 : i32
    return %c0_i32, %arg0 : i32, i32
  }
  func.func @transform_1(%arg0: i32) -> (i32, i32) {
    %c0_i32 = arith.constant 0 : i32
    %c0_i32_0 = arith.constant 0 : i32
    %c0_i32_1 = arith.constant 0 : i32
    return %c0_i32, %c0_i32_0 : i32, i32
  }
  func.func @transform_2(%arg0: i32) -> (i32, i32) {
    %c0_i32 = arith.constant 0 : i32
    %c0_i32_0 = arith.constant 0 : i32
    %c0_i32_1 = arith.constant 0 : i32
    return %c0_i32, %c0_i32_0 : i32, i32
  }
  func.func @transform_3(%arg0: i32) -> (i32, i32) {
    %c0_i32 = arith.constant 0 : i32
    %c0_i32_0 = arith.constant 0 : i32
    %c0_i32_1 = arith.constant 0 : i32
    return %c0_i32, %c0_i32_0 : i32, i32
  }
  func.func @transform_4(%arg0: i32) -> (i32, i32) {
    %c0_i32 = arith.constant 0 : i32
    %c0_i32_0 = arith.constant 0 : i32
    %c0_i32_1 = arith.constant 0 : i32
    return %c0_i32, %c0_i32_0 : i32, i32
  }
  func.func @transform_5(%arg0: i32) -> (i32, i32) {
    %c0_i32 = arith.constant 0 : i32
    %c0_i32_0 = arith.constant 0 : i32
    %c0_i32_1 = arith.constant 0 : i32
    return %c0_i32, %c0_i32_0 : i32, i32
  }
  func.func @transform_6(%arg0: i32) -> (i32, i32) {
    %c0_i32 = arith.constant 0 : i32
    %c0_i32_0 = arith.constant 0 : i32
    %c0_i32_1 = arith.constant 0 : i32
    return %c0_i32, %c0_i32_0 : i32, i32
  }
  func.func @transform_7(%arg0: i32) -> (i32, i32) {
    %c0_i32 = arith.constant 0 : i32
    %c0_i32_0 = arith.constant 0 : i32
    return %c0_i32, %arg0 : i32, i32
  }
}

</mosaic_0001>

<bundles_post_ra>
// kernel: policy_network_forward.1
= control target key start
LH: loop header
LB: loop body
LE: loop exit
PB: predicated region body
PF: predicated region fallthrough
CT: control target
= control target key end

     0   :  { %vm48_vm0 = vcmask 1043456   ;;  %vm41_vm1 = vcmask 31744   ;;  %v437_v3 = vmov 0   ;;  %vm157_vm2 = vcmask 130048   ;;  %s532_s0 = inlined_call_operand.vmem [shape: f32[4,8], index: 0, kind: input, shape index: {}]   ;;  %s533_s1 = inlined_call_operand.vmem [shape: f32[16,4], index: 1, kind: input, shape index: {}]   ;;  %s534_s2 = inlined_call_operand.vmem [shape: f32[16,1], index: 2, kind: input, shape index: {}]   ;;  %s535_s4 = inlined_call_operand.vmem [shape: f32[32,1], index: 4, kind: input, shape index: {}]   ;;  %s536_s6 = inlined_call_operand.vmem [shape: f32[2,1], index: 6, kind: input, shape index: {}]   ;;  %s537_s3 = inlined_call_operand.vmem [shape: f32[32,16], index: 3, kind: input, shape index: {}]   ;;  %s538_s5 = inlined_call_operand.vmem [shape: f32[2,32], index: 5, kind: input, shape index: {}]   ;;  %s539_s7 = inlined_call_operand.vmem [shape: f32[2,8], index: 7, kind: output, shape index: {}]  }
   0x1   :  { %v26_v0 = vld [vmem:[%s532_s0] sm:$0xf]  ;;  %v28_v2 = vld [vmem:[%s533_s1 + $0x8] sm:$0xff]  ;;  %419 = vset.pattern.permute.xlu0 %v437_v3  ;;  %420 = vset.pattern.permute.xlu1 %v437_v3  ;;  %v136_v9 = vld [vmem:[%s535_s4 + $0x18] sm:$0xff]  ;;  %v438_v23 = vmov 0.0   ;;  %vm439_vm3 = vmmov 0   ;;  %v355_v51 = vlaneseq }
   0x2   :  { %v27_v1 = vld [vmem:[%s533_s1] sm:$0xff]  ;;  %390 = vmatprep.subr.msk.mxu0 %vm48_vm0, %v26_v0  ;;  %v30_v4 = vld [vmem:[%s534_s2 + $0x8] sm:$0xff]  ;;  %154 = vperm.xlu1 %420, %v136_v9   ;;  %v135_v10 = vld [vmem:[%s535_s4 + $0x10] sm:$0xff]  ;;  %vm266_vm4 = vcmask 261120  }
   0x3   :  { %392 = vmatprep.mubr.msk.f32.mxu0 %vm41_vm1, %v27_v1  ;;  %391 = vmatpush3.msk.msra.mxu0 %vm48_vm0, %v26_v0  ;;  %v29_v5 = vld [vmem:[%s534_s2] sm:$0xff]  ;;  %v134_v6 = vld [vmem:[%s535_s4 + $0x8] sm:$0xff]  ;;  %v131_v21 = vld [vmem:[%s537_s3 + $0x10] sm:$0xff]  ;;  %v356_v54 = vshrl.u32 %v355_v51, 7 }
   0x4   :  { %38 = vperm.xlu0 %419, %v30_v4   ;;  %393 = vmatmul.mubr.msk.f32.vlgmr.msra.gmra.mxu0 %vm41_vm1, %v28_v2  ;;  %v260_v7 = vld [vmem:[%s536_s6] sm:$0x3]  ;;  %v130_v20 = vld [vmem:[%s537_s3 + $0x8] sm:$0xff]  ;;  %v132_v22 = vld [vmem:[%s537_s3 + $0x18] sm:$0xff] }
   0x5   :  { %v129_v8 = vld [vmem:[%s537_s3] sm:$0xff]  ;;  %405 = vmatprep.subr.mxu0 %v438_v23  ;;  %413 = vmatprep.mubr.msk.f32.mxu0 %vm439_vm3, %v438_v23  ;;  %v360_v59 = vsub.s32 1, %v356_v54  ;;  %vm357_vm6 = vcmp.ge.s32.totalorder %v356_v54, 1 }
   0x6   :  { %399 = vmatprep.mubr.msk.f32.mxu1 %vm157_vm2, %v129_v8  ;;  %149 = vperm.xlu1 %420, %v135_v10   ;;  %v133_v11 = vld [vmem:[%s535_s4] sm:$0xff] }
   0x7   :  { %v259_v39 = vld [vmem:[%s538_s5] sm:$0x3] }
   0x8   :  { %33 = vperm.xlu0 %419, %v29_v5  }
   0xa   :  { %139 = vperm.xlu1 %420, %v133_v11  }
   0xc   :  { %144 = vperm.xlu0 %419, %v134_v6  }
  0x10   :  { %263 = vperm.xlu0 %419, %v260_v7  }
  0x7d   :  { %v155_v24 = vpop.permute.xlu1 %154 }
  0x7f   :  { %v39_v12 = vpop.permute.xlu0 %38 }
  0x81   :  { %v150_v25 = vpop.permute.xlu1 %149 }
  0x83   :  { %v34_v15 = vpop.permute.xlu0 %33 }
  0x85   :  { %v140_v31 = vpop.permute.xlu1 %139 }
  0x87   :  { %v145_v29 = vpop.permute.xlu0 %144 }
  0x8b   :  { %v264_v41 = vpop.permute.xlu0 %263 }
  0xc4   :  { %v394_v13 = vpop.f32.mrf.mxu0 }
  0xc5   :  { %v124_v14 = vadd.f32 %v394_v13, %v39_v12 }
  0xc6   :  { %v118_v16 = vpop.f32.mrf.mxu0 }
  0xc7   :  { %421 = vtanh.f32 %v124_v14  ;;  %v119_v17 = vadd.f32 %v118_v16, %v34_v15 }
  0xc9   :  { %423 = vtanh.f32 %v119_v17 }
  0xd4   :  { %v422_v18 = vpop.eup %421 }
  0xd5   :  { %395 = vmatprep.subr.mxu1 %v422_v18 }
  0xd6   :  { %v424_v19 = vpop.eup %423  ;;  %396 = vmatpush3.msra.mxu1 %v422_v18 }
  0xd7   :  { %397 = vmatprep.subr.mxu1 %v424_v19 }
  0xd8   :  { %398 = vmatpush3.msra.mxu1 %v424_v19 }
  0xd9   :  { %400 = vmatmul.mubr.msk.f32.vlgmr.msra.gmra.mxu1 %vm157_vm2, %v130_v20 }
  0xda   :  { %402 = vmatprep.mubr.msk.f32.mxu1 %vm157_vm2, %v131_v21 }
  0xdd   :  { %403 = vmatmul.mubr.msk.f32.gmra.mxu1 %vm157_vm2, %v132_v22 }
 0x199   :  { %v401_v26 = vpop.f32.mrf.mxu1 }
 0x19a   :  { %v242_v33 = vadd.f32 %v401_v26, %v145_v29 }
 0x19b   :  { %v236_v27 = vpop.f32.mrf.mxu1 }
 0x19c   :  { %v237_v35 = vadd.f32 %v236_v27, %v140_v31 }
 0x19d   :  { %v404_v28 = vpop.f32.mrf.mxu1 }
 0x19e   :  { %v252_v30 = vadd.f32 %v404_v28, %v155_v24 }
 0x19f   :  { %v246_v32 = vpop.f32.mrf.mxu1 }
 0x1a0   :  { %425 = vtanh.f32 %v252_v30  ;;  %v247_v34 = vadd.f32 %v246_v32, %v150_v25 }
 0x1a2   :  { %427 = vtanh.f32 %v247_v34 }
 0x1a3   :  { %429 = vtanh.f32 %v242_v33 }
 0x1a4   :  { %431 = vtanh.f32 %v237_v35 }
 0x1ad   :  { %v426_v36 = vpop.eup %425 }
 0x1ae   :  { %406 = vmatpush3.msra.mxu0 %v426_v36 }
 0x1af   :  { %v428_v37 = vpop.eup %427  ;;  %407 = vmatprep.subr.mxu0 %v438_v23 }
 0x1b0   :  { %408 = vmatpush3.msra.mxu0 %v428_v37  ;;  %v430_v38 = vpop.eup %429 }
 0x1b1   :  { %409 = vmatprep.subr.mxu0 %v438_v23  ;;  %v432_v40 = vpop.eup %431 }
 0x1b2   :  { %410 = vmatpush3.msra.mxu0 %v430_v38 }
 0x1b3   :  { %411 = vmatprep.subr.mxu0 %v438_v23 }
 0x1b4   :  { %412 = vmatpush3.msra.mxu0 %v432_v40 }
 0x1b5   :  { %414 = vmatmul.mubr.msk.f32.vlgmr.msra.gmra.mxu0 %vm266_vm4, %v259_v39 }
 0x275   :  { %v336_v42 = vpop.f32.mrf.mxu0 }
 0x276   :  { %v337_v43 = vadd.f32 %v336_v42, %v264_v41 }
 0x277   :  { %v415_v44 = vpop.f32.mrf.mxu0 }
 0x278   :  { %v341_v45 = vand.u32 2147483647, %v337_v43  ;;  %v340_v58 = vmax.f32 %v337_v43, 0.0 }
 0x27a   :  { %v342_v46 = vsub.f32 0.0, %v341_v45 }
 0x27c   :  { %v343_v47 = vmul.f32 1.442695, %v342_v46 }
 0x27e   :  { %433 = vpow2.f32 %v343_v47 }
 0x28b   :  { %v434_v48 = vpop.eup %433 }
 0x28c   :  { %v345_v49 = vadd.f32 1.0, %v434_v48  ;;  %v348_v50 = vmul.f32 -0.5, %v434_v48  ;;  %v351_v53 = vand.u32 2147483647, %v434_v48 }
 0x28e   :  { %435 = vlog2.f32 %v345_v49  ;;  %v349_v52 = vadd.f32 1.0, %v348_v50  ;;  %vm352_vm5 = vcmp.lt.f32.partialorder %v351_v53, 0.0004427343 }
 0x290   :  { %v350_v57 = vmul.f32 %v434_v48, %v349_v52 }
 0x29b   :  { %v436_v55 = vpop.eup %435 }
 0x29c   :  { %v347_v56 = vmul.f32 0.6931472, %v436_v55 }
 0x29e   :  { %v353_v60 = vsel %vm352_vm5, %v350_v57, %v347_v56 }
 0x29f   :  { %v354_v61 = vadd.f32 %v353_v60, %v340_v58 }
 0x2a1   :  { %v361_v62 = vrot.slane %v354_v61, %v360_v59 }
 0x2a3   :  { %v362_v63 = vsel %vm357_vm6, %v361_v62, %v337_v43 }
 0x2a4   :  { %363 = vst [vmem:[%s539_s7] sm:$0x3] %v362_v63 }

</bundles_post_ra>
